<compile_context>
chip_gen: v7x
topology: tpu7x:2x2x1
jax: 0.10.0
libtpu: 0.0.40
codegen_flags: <defaults>
</compile_context>

<pallas_src>
import functools
import math

import jax
import jax.numpy as jnp
from jax.experimental import pallas as pl
from jax.experimental.pallas import tpu as pltpu


def _round_up(n, m):
    return ((n + m - 1) // m) * m


def _padded_vmem_bytes(rows, cols, itemsize=4):
    # VMEM tiles are padded to (8, 128) granules.
    return _round_up(max(rows, 1), 8) * _round_up(max(cols, 1), 128) * itemsize


def mlp_kernel(x_ref, w_ref, b_ref, out_ref, *, ifsigmoid):
    # One [TB, nfeat] f32 batch tile per grid step; fused weight row (1, nfeat)
    # and fused bias (1, 1) are VMEM-resident. Everything stays f32 (VPU mul,
    # XLU lane-reduce, EUP sigmoid) -- the MXU is not needed after fusion.
    y = jnp.sum(x_ref[...] * w_ref[...], axis=1, keepdims=True) + b_ref[...]
    if ifsigmoid:
        y = jax.nn.sigmoid(y)
    out_ref[...] = y.astype(out_ref.dtype)


def mlp_forward(x, params, *, ifsigmoid, block_b=2048):
    """x: [B, nfeat] float32 -> [B, 1] float32 (matches MLP.forward)."""
    B, nfeat = x.shape

    # ---- Fuse the activation-free layer chain once, in f32 (exact math). ----
    w_fused = (params["w1"] @ params["w2"] @ params["w3"]
               @ params["w4"] @ params["w5"])                       # [nfeat, 1]
    b_fused = ((((params["b1"] @ params["w2"] + params["b2"])
                 @ params["w3"] + params["b3"])
                @ params["w4"] + params["b4"])
               @ params["w5"] + params["b5"])                        # [1, 1]
    w_row = w_fused.astype(jnp.float32).T                           # [1, nfeat]
    b_fused = b_fused.astype(jnp.float32)

    # ---- Batch tile selection. ----
    lane_cols = _round_up(nfeat, 128)
    # Keep each (double-buffered) x tile under ~4 MiB of lane-padded VMEM.
    max_tb_vmem = max(128, ((4 * 1024 * 1024) // (lane_cols * 4)) // 128 * 128)
    tb = max(128, min(_round_up(block_b, 128), max_tb_vmem))
    # Prefer >= 2 grid steps when the batch allows (v7x megacore sharding).
    if B >= 256:
        tb = min(tb, max(128, _round_up(-(-B // 2), 128)))
    if tb >= B:
        tb = B  # single block equal to the full array dims (always layout-legal)

    grid = (pl.cdiv(B, tb),)

    in_specs = [
        pl.BlockSpec((tb, nfeat), lambda i: (i, 0)),   # streaming x tile
        pl.BlockSpec((1, nfeat), lambda i: (0, 0)),    # fused weight row (resident)
        pl.BlockSpec((1, 1), lambda i: (0, 0)),        # fused bias (resident)
    ]
    out_specs = pl.BlockSpec((tb, 1), lambda i: (i, 0))

    # Honest cost estimate for the fused kernel.
    cost = pl.CostEstimate(
        flops=int(2 * B * nfeat + B),
        transcendentals=int(B if ifsigmoid else 0),
        bytes_accessed=int(B * nfeat * 4 + B * 4 + nfeat * 4 + 4),
    )

    # True per-step VMEM footprint (lane-padded): double-buffered x/out tiles,
    # resident weight/bias, plus one x-tile-sized intermediate; 2x headroom.
    x_tile = _padded_vmem_bytes(tb, nfeat)
    out_tile = _padded_vmem_bytes(tb, 1)
    per_step = (2 * x_tile + 2 * out_tile + x_tile
                + _padded_vmem_bytes(1, nfeat) + _padded_vmem_bytes(1, 1))
    vmem_limit = int(min(32 * 1024 * 1024, max(4 * 1024 * 1024, 2 * per_step)))

    out = pl.pallas_call(
        functools.partial(mlp_kernel, ifsigmoid=ifsigmoid),
        out_shape=jax.ShapeDtypeStruct((B, 1), jnp.float32),
        grid=grid,
        in_specs=in_specs,
        out_specs=out_specs,
        compiler_params=pltpu.CompilerParams(
            dimension_semantics=("parallel",),
            vmem_limit_bytes=vmem_limit,
        ),
        cost_estimate=cost,
    )(x.astype(jnp.float32), w_row, b_fused)

    return out


def init_mlp_params(key, nfeat, layer_size=64):
    """Deterministic init mirroring MLP.init_weights shapes/distributions.

    Weights are stored transposed vs PyTorch ([in_features, out_features]) so
    y = x @ W + b matches nn.Linear.
    """
    ks = jax.random.split(key, 5)
    size = layer_size

    def uniform(k, shape, bound):
        return jax.random.uniform(k, shape, jnp.float32, -bound, bound)

    # fc1..fc3: uniform(-0.05, 0.05), bias 0.
    w1 = uniform(ks[0], (nfeat, size), 0.05)
    w2 = uniform(ks[1], (size, size), 0.05)
    w3 = uniform(ks[2], (size, size), 0.05)
    # fc4: xavier_uniform with relu gain (= sqrt(2)), bias 0.
    xav = math.sqrt(2.0) * math.sqrt(6.0 / (size + size))
    w4 = uniform(ks[3], (size, size), xav)
    # fc5: PyTorch default Linear init (bound = 1/sqrt(fan_in)), bias 0.
    w5 = uniform(ks[4], (size, 1), 1.0 / math.sqrt(size))

    zeros = lambda n: jnp.zeros((1, n), jnp.float32)
    return {
        "w1": w1, "b1": zeros(size),
        "w2": w2, "b2": zeros(size),
        "w3": w3, "b3": zeros(size),
        "w4": w4, "b4": zeros(size),
        "w5": w5, "b5": zeros(1),
    }


def mlp_reference(x, p, *, ifsigmoid):
    # Un-fused 5-layer chain in f32 (exactly the PyTorch forward).
    h = x @ p["w1"] + p["b1"]
    h = h @ p["w2"] + p["b2"]
    h = h @ p["w3"] + p["b3"]
    emb = h @ p["w4"] + p["b4"]
    y = emb @ p["w5"] + p["b5"]
    return jax.nn.sigmoid(y) if ifsigmoid else y


if __name__ == "__main__":
    key = jax.random.PRNGKey(0)
    k_x, k_p = jax.random.split(key)

    # B=200 exercises the multi-step grid (2 tiles of 128) plus the ragged
    # last block (72 valid rows) without any wrapper-side padding.
    B, NFEAT, LAYER = 200, 32, 64

    x = jax.random.normal(k_x, (B, NFEAT), jnp.float32)
    params = init_mlp_params(k_p, NFEAT, LAYER)

    for ifsig in (True, False):
        out = mlp_forward(x, params, ifsigmoid=ifsig)
        out = jax.block_until_ready(out)
        ref = mlp_reference(x, params, ifsigmoid=ifsig)
        assert out.shape == (B, 1)
        # Fully f32 (fused chain) vs f32 un-fused chain -> tight tolerance.
        assert jnp.allclose(out, ref, atol=1e-4, rtol=1e-4), (
            ifsig, float(jnp.max(jnp.abs(out - ref))))

    print("KERNEL_OK")
</pallas_src>

<mosaic_0001>
module attributes {stable_mosaic.version = 11 : i64} {
  func.func @mlp_kernel(%arg0: i32, %arg1: memref<200x32xf32, #tpu.memory_space<vmem>>, %arg2: memref<1x32xf32, #tpu.memory_space<vmem>>, %arg3: memref<1x1xf32, #tpu.memory_space<vmem>>, %arg4: memref<200x1xf32, #tpu.memory_space<vmem>>) attributes {dimension_semantics = [#tpu.dimension_semantics<parallel>], iteration_bounds = array<i64: 1>, scalar_prefetch = 0 : i64, scratch_operands = 0 : i64, tpu.core_type = #tpu.core_type<tc>, window_params = [{transform_indices = @transform_0, window_bounds = array<i64: 200, 32>}, {pipeline_mode = #tpu.pipeline_mode<synchronous>, transform_indices = @transform_1, window_bounds = array<i64: 1, 32>}, {pipeline_mode = #tpu.pipeline_mode<synchronous>, transform_indices = @transform_2, window_bounds = array<i64: 1, 1>}, {transform_indices = @transform_3, window_bounds = array<i64: 200, 1>}]} {
    %c0 = arith.constant 0 : index
    %c0_0 = arith.constant 0 : index
    %0 = vector.load %arg1[%c0, %c0_0] : memref<200x32xf32, #tpu.memory_space<vmem>>, vector<200x32xf32>
    %c0_1 = arith.constant 0 : index
    %c0_2 = arith.constant 0 : index
    %1 = vector.load %arg2[%c0_1, %c0_2] : memref<1x32xf32, #tpu.memory_space<vmem>>, vector<1x32xf32>
    %2 = vector.broadcast %1 : vector<1x32xf32> to vector<200x32xf32>
    %3 = arith.mulf %0, %2 : vector<200x32xf32>
    %cst = arith.constant dense<0.000000e+00> : vector<200xf32>
    %4 = vector.multi_reduction <add>, %3, %cst [1] : vector<200x32xf32> to vector<200xf32>
    %5 = vector.shape_cast %4 : vector<200xf32> to vector<200x1xf32>
    %c0_3 = arith.constant 0 : index
    %c0_4 = arith.constant 0 : index
    %6 = vector.load %arg3[%c0_3, %c0_4] : memref<1x1xf32, #tpu.memory_space<vmem>>, vector<1x1xf32>
    %7 = vector.broadcast %6 : vector<1x1xf32> to vector<200x1xf32>
    %8 = arith.addf %5, %7 : vector<200x1xf32>
    %9 = arith.negf %8 : vector<200x1xf32>
    %10 = math.exp %9 : vector<200x1xf32>
    %cst_5 = arith.constant 1.000000e+00 : f32
    %11 = vector.broadcast %cst_5 : f32 to vector<200x1xf32>
    %12 = arith.addf %11, %10 : vector<200x1xf32>
    %13 = arith.divf %11, %12 : vector<200x1xf32>
    %c0_6 = arith.constant 0 : index
    %c0_7 = arith.constant 0 : index
    %14 = vector.load %arg4[%c0_6, %c0_7] : memref<200x1xf32, #tpu.memory_space<vmem>>, vector<200x1xf32>
    tpu.vector_store %arg4[%c0_6, %c0_7], %13 {strides = array<i32>} : memref<200x1xf32, #tpu.memory_space<vmem>>, vector<200x1xf32>,
    return
  }
  func.func @transform_0(%arg0: i32) -> (i32, i32) {
    %c0_i32 = arith.constant 0 : i32
    %c0_i32_0 = arith.constant 0 : i32
    return %arg0, %c0_i32 : i32, i32
  }
  func.func @transform_1(%arg0: i32) -> (i32, i32) {
    %c0_i32 = arith.constant 0 : i32
    %c0_i32_0 = arith.constant 0 : i32
    %c0_i32_1 = arith.constant 0 : i32
    return %c0_i32, %c0_i32_0 : i32, i32
  }
  func.func @transform_2(%arg0: i32) -> (i32, i32) {
    %c0_i32 = arith.constant 0 : i32
    %c0_i32_0 = arith.constant 0 : i32
    %c0_i32_1 = arith.constant 0 : i32
    return %c0_i32, %c0_i32_0 : i32, i32
  }
  func.func @transform_3(%arg0: i32) -> (i32, i32) {
    %c0_i32 = arith.constant 0 : i32
    %c0_i32_0 = arith.constant 0 : i32
    return %arg0, %c0_i32 : i32, i32
  }
}

</mosaic_0001>

<bundles_post_ra>
// kernel: tpu_custom_call.1
= control target key start
LH: loop header
LB: loop body
LE: loop exit
PB: predicated region body
PF: predicated region fallthrough
CT: control target
= control target key end

     0   :  { %vm73_vm0 = vcmask 261120   ;;  %vm331_vm1 = vcmask 7168   ;;  %s768_s0 = inlined_call_operand.vmem [shape: f32[200,32], index: 0, kind: input, shape index: {}]   ;;  %s769_s1 = inlined_call_operand.vmem [shape: f32[1,32], index: 1, kind: input, shape index: {}]   ;;  %s770_s2 = inlined_call_operand.<no memory space> [shape: f32[1,1], index: 2, kind: input, shape index: {}]   ;;  %s771_s3 = inlined_call_operand.vmem [shape: f32[200,1], index: 3, kind: output, shape index: {}]  }
   0x1   :  { %v16_v0 = vld [vmem:[%s768_s0] sm:$0xff]  ;;  %v18_v2 = vld [vmem:[%s768_s0 + $0x10] sm:$0xff]  ;;  %v8_v3 = vstv %s770_s2  ;;  %v17_v6 = vld [vmem:[%s768_s0 + $0x8] sm:$0xff] }
   0x2   :  { %v514_v1 = vld [vmem:[%s769_s1] ss:$0 sm:$0xff]  ;;  %v19_v7 = vld [vmem:[%s768_s0 + $0x18] sm:$0xff]  ;;  %9 = vst [vmem:[#allocation2] sm:$0x1] %v8_v3  ;;  %v21_v11 = vld [vmem:[%s768_s0 + $0x28] sm:$0xff] }
   0x3   :  { %v48_v4 = vmul.f32 %v514_v1, %v16_v0  ;;  %v50_v5 = vmul.f32 %v514_v1, %v18_v2  ;;  %v49_v8 = vmul.f32 %v514_v1, %v17_v6  ;;  %v51_v9 = vmul.f32 %v514_v1, %v19_v7  ;;  %v20_v10 = vld [vmem:[%s768_s0 + $0x20] sm:$0xff]  ;;  %v22_v18 = vld [vmem:[%s768_s0 + $0x30] sm:$0xff]  ;;  %v23_v19 = vld [vmem:[%s768_s0 + $0x38] sm:$0xff] }
   0x4   :  { %v52_v16 = vmul.f32 %v514_v1, %v20_v10  ;;  %v53_v17 = vmul.f32 %v514_v1, %v21_v11  ;;  %v54_v22 = vmul.f32 %v514_v1, %v22_v18  ;;  %v55_v23 = vmul.f32 %v514_v1, %v23_v19  ;;  %v24_v24 = vld [vmem:[%s768_s0 + $0x40] sm:$0xff]  ;;  %v25_v25 = vld [vmem:[%s768_s0 + $0x48] sm:$0xff]  ;;  %v26_v30 = vld [vmem:[%s768_s0 + $0x50] sm:$0xff] }
   0x5   :  { %v74_v12 = vsel %vm73_vm0, %v48_v4, 0.0  ;;  %v80_v13 = vsel %vm73_vm0, %v50_v5, 0.0  ;;  %v77_v14 = vsel %vm73_vm0, %v49_v8, 0.0  ;;  %v83_v15 = vsel %vm73_vm0, %v51_v9, 0.0  ;;  %v27_v31 = vld [vmem:[%s768_s0 + $0x58] sm:$0xff]  ;;  %v28_v36 = vld [vmem:[%s768_s0 + $0x60] sm:$0xff] }
   0x6   :  { %75 = vadd.xlane.f32.xlu0 %v74_v12  ;;  %81 = vadd.xlane.f32.xlu1 %v80_v13  ;;  %v86_v20 = vsel %vm73_vm0, %v52_v16, 0.0  ;;  %v89_v21 = vsel %vm73_vm0, %v53_v17, 0.0  ;;  %v92_v26 = vsel %vm73_vm0, %v54_v22, 0.0  ;;  %v95_v27 = vsel %vm73_vm0, %v55_v23, 0.0  ;;  %v29_v37 = vld [vmem:[%s768_s0 + $0x68] sm:$0xff]  ;;  %v30_v42 = vld [vmem:[%s768_s0 + $0x70] sm:$0xff] }
   0x7   :  { %v56_v28 = vmul.f32 %v514_v1, %v24_v24  ;;  %v57_v29 = vmul.f32 %v514_v1, %v25_v25  ;;  %v58_v34 = vmul.f32 %v514_v1, %v26_v30  ;;  %v59_v35 = vmul.f32 %v514_v1, %v27_v31  ;;  %v31_v43 = vld [vmem:[%s768_s0 + $0x78] sm:$0xff]  ;;  %v32_v48 = vld [vmem:[%s768_s0 + $0x80] sm:$0xff]  ;;  %v33_v49 = vld [vmem:[%s768_s0 + $0x88] sm:$0xff] }
   0x8   :  { %v60_v40 = vmul.f32 %v514_v1, %v28_v36  ;;  %v61_v41 = vmul.f32 %v514_v1, %v29_v37  ;;  %v62_v46 = vmul.f32 %v514_v1, %v30_v42  ;;  %v63_v47 = vmul.f32 %v514_v1, %v31_v43  ;;  %v34_v54 = vld [vmem:[%s768_s0 + $0x90] sm:$0xff]  ;;  %v35_v55 = vld [vmem:[%s768_s0 + $0x98] sm:$0xff]  ;;  %v36_v60 = vld [vmem:[%s768_s0 + $0xa0] sm:$0xff] }
   0x9   :  { %v98_v32 = vsel %vm73_vm0, %v56_v28, 0.0  ;;  %v101_v33 = vsel %vm73_vm0, %v57_v29, 0.0  ;;  %v104_v38 = vsel %vm73_vm0, %v58_v34, 0.0  ;;  %v107_v39 = vsel %vm73_vm0, %v59_v35, 0.0  ;;  %v37_v61 = vld [vmem:[%s768_s0 + $0xa8] sm:$0xff]  ;;  %v38_v3 = vld [vmem:[%s768_s0 + $0xb0] sm:$0xff] }
   0xa   :  { %78 = vadd.xlane.f32.xlu0 %v77_v14  ;;  %84 = vadd.xlane.f32.xlu1 %v83_v15  ;;  %v110_v44 = vsel %vm73_vm0, %v60_v40, 0.0  ;;  %v113_v45 = vsel %vm73_vm0, %v61_v41, 0.0  ;;  %v116_v50 = vsel %vm73_vm0, %v62_v46, 0.0  ;;  %v119_v51 = vsel %vm73_vm0, %v63_v47, 0.0  ;;  %v39_v4 = vld [vmem:[%s768_s0 + $0xb8] sm:$0xff]  ;;  %v40_v9 = vld [vmem:[%s768_s0 + $0xc0] sm:$0xff] }
   0xb   :  { %v64_v52 = vmul.f32 %v514_v1, %v32_v48  ;;  %v65_v53 = vmul.f32 %v514_v1, %v33_v49  ;;  %v66_v58 = vmul.f32 %v514_v1, %v34_v54  ;;  %v67_v59 = vmul.f32 %v514_v1, %v35_v55  ;;  %v641_v14 = vld [vmem:[#allocation2] ss:$0 sm:$0xff] }
   0xc   :  { %v68_v0 = vmul.f32 %v514_v1, %v36_v60  ;;  %v69_v2 = vmul.f32 %v514_v1, %v37_v61  ;;  %v70_v7 = vmul.f32 %v514_v1, %v38_v3  ;;  %v71_v8 = vmul.f32 %v514_v1, %v39_v4 }
   0xd   :  { %v122_v56 = vsel %vm73_vm0, %v64_v52, 0.0  ;;  %v125_v57 = vsel %vm73_vm0, %v65_v53, 0.0  ;;  %v128_v62 = vsel %vm73_vm0, %v66_v58, 0.0  ;;  %v131_v63 = vsel %vm73_vm0, %v67_v59, 0.0 }
   0xe   :  { %87 = vadd.xlane.f32.xlu0 %v86_v20  ;;  %90 = vadd.xlane.f32.xlu1 %v89_v21  ;;  %v134_v5 = vsel %vm73_vm0, %v68_v0, 0.0  ;;  %v137_v6 = vsel %vm73_vm0, %v69_v2, 0.0  ;;  %v140_v10 = vsel %vm73_vm0, %v70_v7, 0.0  ;;  %v143_v11 = vsel %vm73_vm0, %v71_v8, 0.0 }
   0xf   :  { %v72_v12 = vmul.f32 %v514_v1, %v40_v9 }
  0x11   :  { %v146_v13 = vsel %vm73_vm0, %v72_v12, 0.0 }
  0x12   :  { %93 = vadd.xlane.f32.xlu0 %v92_v26  ;;  %96 = vadd.xlane.f32.xlu1 %v95_v27 }
  0x16   :  { %99 = vadd.xlane.f32.xlu0 %v98_v32  ;;  %102 = vadd.xlane.f32.xlu1 %v101_v33 }
  0x1a   :  { %105 = vadd.xlane.f32.xlu0 %v104_v38  ;;  %108 = vadd.xlane.f32.xlu1 %v107_v39 }
  0x1e   :  { %111 = vadd.xlane.f32.xlu0 %v110_v44  ;;  %114 = vadd.xlane.f32.xlu1 %v113_v45 }
  0x22   :  { %117 = vadd.xlane.f32.xlu0 %v116_v50  ;;  %120 = vadd.xlane.f32.xlu1 %v119_v51 }
  0x26   :  { %123 = vadd.xlane.f32.xlu0 %v122_v56  ;;  %126 = vadd.xlane.f32.xlu1 %v125_v57 }
  0x2a   :  { %129 = vadd.xlane.f32.xlu0 %v128_v62  ;;  %132 = vadd.xlane.f32.xlu1 %v131_v63 }
  0x2e   :  { %135 = vadd.xlane.f32.xlu0 %v134_v5  ;;  %138 = vadd.xlane.f32.xlu1 %v137_v6 }
  0x32   :  { %141 = vadd.xlane.f32.xlu0 %v140_v10  ;;  %144 = vadd.xlane.f32.xlu1 %v143_v11 }
  0x36   :  { %147 = vadd.xlane.f32.xlu0 %v146_v13 }
  0x93   :  { %v76_v15 = vpop.xlane.xlu0 %75  ;;  %v82_v16 = vpop.xlane.xlu1 %81 }
  0x94   :  { %v156_v17 = vadd.f32 %v641_v14, %v76_v15  ;;  %v158_v18 = vadd.f32 %v641_v14, %v82_v16 }
  0x96   :  { %v363_v19 = vmul.f32 -1.442695, %v156_v17  ;;  %v365_v20 = vmul.f32 -1.442695, %v158_v18 }
  0x97   :  { %v79_v21 = vpop.xlane.xlu0 %78  ;;  %v85_v22 = vpop.xlane.xlu1 %84 }
  0x98   :  { %388 = vpow2.f32 %v363_v19  ;;  %v157_v1 = vadd.f32 %v641_v14, %v79_v21  ;;  %v159_v23 = vadd.f32 %v641_v14, %v85_v22 }
  0x99   :  { %390 = vpow2.f32 %v365_v20 }
  0x9a   :  { %v364_v24 = vmul.f32 -1.442695, %v157_v1  ;;  %v366_v25 = vmul.f32 -1.442695, %v159_v23 }
  0x9b   :  { %v88_v26 = vpop.xlane.xlu0 %87  ;;  %v91_v27 = vpop.xlane.xlu1 %90 }
  0x9c   :  { %392 = vpow2.f32 %v364_v24  ;;  %v160_v28 = vadd.f32 %v641_v14, %v88_v26  ;;  %v161_v29 = vadd.f32 %v641_v14, %v91_v27 }
  0x9d   :  { %394 = vpow2.f32 %v366_v25 }
  0x9e   :  { %v367_v30 = vmul.f32 -1.442695, %v160_v28  ;;  %v368_v31 = vmul.f32 -1.442695, %v161_v29 }
  0x9f   :  { %v94_v32 = vpop.xlane.xlu0 %93  ;;  %v97_v33 = vpop.xlane.xlu1 %96 }
  0xa0   :  { %396 = vpow2.f32 %v367_v30  ;;  %v162_v34 = vadd.f32 %v641_v14, %v94_v32  ;;  %v163_v35 = vadd.f32 %v641_v14, %v97_v33 }
  0xa1   :  { %398 = vpow2.f32 %v368_v31 }
  0xa2   :  { %v389_v36 = vpop.eup %388  ;;  %v369_v37 = vmul.f32 -1.442695, %v162_v34  ;;  %v370_v40 = vmul.f32 -1.442695, %v163_v35 }
  0xa3   :  { %v391_v38 = vpop.eup %390  ;;  %v256_v39 = vadd.f32 1.0, %v389_v36  ;;  %v100_v41 = vpop.xlane.xlu0 %99 }
  0xa4   :  { %v103_v42 = vpop.xlane.xlu1 %102  ;;  %v258_v43 = vadd.f32 1.0, %v391_v38  ;;  %400 = vpow2.f32 %v369_v37  ;;  %v164_v44 = vadd.f32 %v641_v14, %v100_v41 }
  0xa5   :  { %v165_v45 = vadd.f32 %v641_v14, %v103_v42  ;;  %402 = vrcp.f32 %v256_v39 }
  0xa6   :  { %v393_v46 = vpop.eup %392  ;;  %404 = vrcp.f32 %v258_v43  ;;  %v371_v47 = vmul.f32 -1.442695, %v164_v44 }
  0xa7   :  { %v395_v48 = vpop.eup %394  ;;  %v257_v49 = vadd.f32 1.0, %v393_v46  ;;  %406 = vpow2.f32 %v370_v40  ;;  %v372_v50 = vmul.f32 -1.442695, %v165_v45  ;;  %v106_v51 = vpop.xlane.xlu0 %105 }
  0xa8   :  { %v109_v52 = vpop.xlane.xlu1 %108  ;;  %v259_v53 = vadd.f32 1.0, %v395_v48  ;;  %408 = vpow2.f32 %v371_v47  ;;  %v166_v54 = vadd.f32 %v641_v14, %v106_v51 }
  0xa9   :  { %v167_v55 = vadd.f32 %v641_v14, %v109_v52  ;;  %410 = vrcp.f32 %v257_v49 }
  0xaa   :  { %v397_v56 = vpop.eup %396  ;;  %412 = vrcp.f32 %v259_v53  ;;  %v373_v57 = vmul.f32 -1.442695, %v166_v54 }
  0xab   :  { %v399_v58 = vpop.eup %398  ;;  %v260_v59 = vadd.f32 1.0, %v397_v56  ;;  %414 = vpow2.f32 %v372_v50  ;;  %v374_v60 = vmul.f32 -1.442695, %v167_v55  ;;  %v112_v61 = vpop.xlane.xlu0 %111 }
  0xac   :  { %v115_v62 = vpop.xlane.xlu1 %114  ;;  %v261_v63 = vadd.f32 1.0, %v399_v58  ;;  %416 = vpow2.f32 %v373_v57  ;;  %v168_v0 = vadd.f32 %v641_v14, %v112_v61 }
  0xad   :  { %v169_v2 = vadd.f32 %v641_v14, %v115_v62  ;;  %418 = vrcp.f32 %v260_v59 }
  0xae   :  { %v401_v3 = vpop.eup %400  ;;  %420 = vrcp.f32 %v261_v63  ;;  %v375_v4 = vmul.f32 -1.442695, %v168_v0 }
  0xaf   :  { %v376_v5 = vmul.f32 -1.442695, %v169_v2  ;;  %v403_v6 = vpop.eup %402  ;;  %v262_v7 = vadd.f32 1.0, %v401_v3  ;;  %422 = vpow2.f32 %v374_v60  ;;  %v118_v8 = vpop.xlane.xlu0 %117 }
  0xb0   :  { %v121_v9 = vpop.xlane.xlu1 %120  ;;  %v405_v10 = vpop.eup %404  ;;  %332 = vst.msk [vmem:[%s771_s3] sm:$0xff] %vm331_vm1, %v403_v6  ;;  %424 = vpow2.f32 %v375_v4  ;;  %v170_v11 = vadd.f32 %v641_v14, %v118_v8 }
  0xb1   :  { %v171_v12 = vadd.f32 %v641_v14, %v121_v9  ;;  %v407_v13 = vpop.eup %406  ;;  %334 = vst.msk [vmem:[%s771_s3 + $0x10] sm:$0xff] %vm331_vm1, %v405_v10  ;;  %426 = vrcp.f32 %v262_v7 }
  0xb2   :  { %v409_v15 = vpop.eup %408  ;;  %v263_v16 = vadd.f32 1.0, %v407_v13  ;;  %428 = vpow2.f32 %v376_v5  ;;  %v377_v17 = vmul.f32 -1.442695, %v170_v11 }
  0xb3   :  { %v411_v18 = vpop.eup %410  ;;  %v264_v19 = vadd.f32 1.0, %v409_v15  ;;  %v378_v20 = vmul.f32 -1.442695, %v171_v12  ;;  %v124_v21 = vpop.xlane.xlu0 %123 }
  0xb4   :  { %v127_v22 = vpop.xlane.xlu1 %126  ;;  %v413_v1 = vpop.eup %412  ;;  %333 = vst.msk [vmem:[%s771_s3 + $0x8] sm:$0xff] %vm331_vm1, %v411_v18  ;;  %430 = vrcp.f32 %v263_v16  ;;  %v172_v23 = vadd.f32 %v641_v14, %v124_v21 }
  0xb5   :  { %v173_v24 = vadd.f32 %v641_v14, %v127_v22  ;;  %v415_v25 = vpop.eup %414  ;;  %335 = vst.msk [vmem:[%s771_s3 + $0x18] sm:$0xff] %vm331_vm1, %v413_v1  ;;  %432 = vrcp.f32 %v264_v19 }
  0xb6   :  { %v417_v26 = vpop.eup %416  ;;  %v265_v27 = vadd.f32 1.0, %v415_v25  ;;  %434 = vpow2.f32 %v377_v17  ;;  %v379_v28 = vmul.f32 -1.442695, %v172_v23 }
  0xb7   :  { %v419_v29 = vpop.eup %418  ;;  %v266_v30 = vadd.f32 1.0, %v417_v26  ;;  %436 = vpow2.f32 %v378_v20  ;;  %v380_v31 = vmul.f32 -1.442695, %v173_v24  ;;  %v130_v32 = vpop.xlane.xlu0 %129 }
  0xb8   :  { %v133_v33 = vpop.xlane.xlu1 %132  ;;  %v421_v34 = vpop.eup %420  ;;  %336 = vst.msk [vmem:[%s771_s3 + $0x20] sm:$0xff] %vm331_vm1, %v419_v29  ;;  %438 = vrcp.f32 %v265_v27  ;;  %v174_v35 = vadd.f32 %v641_v14, %v130_v32 }
  0xb9   :  { %v175_v36 = vadd.f32 %v641_v14, %v133_v33  ;;  %v423_v37 = vpop.eup %422  ;;  %337 = vst.msk [vmem:[%s771_s3 + $0x28] sm:$0xff] %vm331_vm1, %v421_v34  ;;  %440 = vrcp.f32 %v266_v30 }
  0xba   :  { %v425_v38 = vpop.eup %424  ;;  %v267_v39 = vadd.f32 1.0, %v423_v37  ;;  %442 = vpow2.f32 %v379_v28  ;;  %v381_v40 = vmul.f32 -1.442695, %v174_v35 }
  0xbb   :  { %v427_v41 = vpop.eup %426  ;;  %v268_v42 = vadd.f32 1.0, %v425_v38  ;;  %444 = vpow2.f32 %v380_v31  ;;  %v136_v43 = vpop.xlane.xlu0 %135  ;;  %v382_v46 = vmul.f32 -1.442695, %v175_v36 }
  0xbc   :  { %v139_v44 = vpop.xlane.xlu1 %138  ;;  %v429_v45 = vpop.eup %428  ;;  %338 = vst.msk [vmem:[%s771_s3 + $0x30] sm:$0xff] %vm331_vm1, %v427_v41  ;;  %446 = vrcp.f32 %v267_v39  ;;  %v176_v47 = vadd.f32 %v641_v14, %v136_v43 }
  0xbd   :  { %v177_v48 = vadd.f32 %v641_v14, %v139_v44  ;;  %448 = vrcp.f32 %v268_v42  ;;  %v269_v49 = vadd.f32 1.0, %v429_v45 }
  0xbe   :  { %v431_v50 = vpop.eup %430  ;;  %450 = vpow2.f32 %v381_v40  ;;  %v383_v51 = vmul.f32 -1.442695, %v176_v47 }
  0xbf   :  { %v384_v52 = vmul.f32 -1.442695, %v177_v48  ;;  %v433_v53 = vpop.eup %432  ;;  %339 = vst.msk [vmem:[%s771_s3 + $0x38] sm:$0xff] %vm331_vm1, %v431_v50  ;;  %452 = vrcp.f32 %v269_v49  ;;  %v142_v54 = vpop.xlane.xlu0 %141 }
  0xc0   :  { %v145_v55 = vpop.xlane.xlu1 %144  ;;  %v435_v56 = vpop.eup %434  ;;  %340 = vst.msk [vmem:[%s771_s3 + $0x40] sm:$0xff] %vm331_vm1, %v433_v53  ;;  %454 = vpow2.f32 %v382_v46  ;;  %v178_v57 = vadd.f32 %v641_v14, %v142_v54 }
  0xc1   :  { %v179_v58 = vadd.f32 %v641_v14, %v145_v55  ;;  %v437_v59 = vpop.eup %436  ;;  %v270_v60 = vadd.f32 1.0, %v435_v56  ;;  %456 = vpow2.f32 %v383_v51 }
  0xc2   :  { %v439_v61 = vpop.eup %438  ;;  %v271_v62 = vadd.f32 1.0, %v437_v59  ;;  %458 = vpow2.f32 %v384_v52  ;;  %v385_v63 = vmul.f32 -1.442695, %v178_v57 }
  0xc3   :  { %v386_v0 = vmul.f32 -1.442695, %v179_v58  ;;  %v441_v2 = vpop.eup %440  ;;  %341 = vst.msk [vmem:[%s771_s3 + $0x48] sm:$0xff] %vm331_vm1, %v439_v61  ;;  %460 = vrcp.f32 %v270_v60  ;;  %v148_v3 = vpop.xlane.xlu0 %147 }
  0xc4   :  { %v443_v4 = vpop.eup %442  ;;  %342 = vst.msk [vmem:[%s771_s3 + $0x50] sm:$0xff] %vm331_vm1, %v441_v2  ;;  %462 = vrcp.f32 %v271_v62  ;;  %v180_v5 = vadd.f32 %v641_v14, %v148_v3 }
  0xc5   :  { %v445_v6 = vpop.eup %444  ;;  %v272_v7 = vadd.f32 1.0, %v443_v4  ;;  %464 = vpow2.f32 %v385_v63 }
  0xc6   :  { %v447_v8 = vpop.eup %446  ;;  %v273_v9 = vadd.f32 1.0, %v445_v6  ;;  %466 = vpow2.f32 %v386_v0  ;;  %v387_v10 = vmul.f32 -1.442695, %v180_v5 }
  0xc7   :  { %v449_v11 = vpop.eup %448  ;;  %343 = vst.msk [vmem:[%s771_s3 + $0x58] sm:$0xff] %vm331_vm1, %v447_v8  ;;  %468 = vrcp.f32 %v272_v7 }
  0xc8   :  { %v451_v12 = vpop.eup %450  ;;  %344 = vst.msk [vmem:[%s771_s3 + $0x60] sm:$0xff] %vm331_vm1, %v449_v11  ;;  %470 = vrcp.f32 %v273_v9 }
  0xc9   :  { %v453_v14 = vpop.eup %452  ;;  %v274_v13 = vadd.f32 1.0, %v451_v12  ;;  %472 = vpow2.f32 %v387_v10 }
  0xca   :  { %v455_v15 = vpop.eup %454  ;;  %345 = vst.msk [vmem:[%s771_s3 + $0x68] sm:$0xff] %vm331_vm1, %v453_v14 }
  0xcb   :  { %v457_v16 = vpop.eup %456  ;;  %474 = vrcp.f32 %v274_v13  ;;  %v275_v17 = vadd.f32 1.0, %v455_v15 }
  0xcc   :  { %v459_v18 = vpop.eup %458  ;;  %v276_v19 = vadd.f32 1.0, %v457_v16 }
  0xcd   :  { %v461_v20 = vpop.eup %460  ;;  %476 = vrcp.f32 %v275_v17  ;;  %v277_v21 = vadd.f32 1.0, %v459_v18 }
  0xce   :  { %v463_v22 = vpop.eup %462  ;;  %346 = vst.msk [vmem:[%s771_s3 + $0x70] sm:$0xff] %vm331_vm1, %v461_v20  ;;  %478 = vrcp.f32 %v276_v19 }
  0xcf   :  { %v465_v1 = vpop.eup %464  ;;  %347 = vst.msk [vmem:[%s771_s3 + $0x78] sm:$0xff] %vm331_vm1, %v463_v22  ;;  %480 = vrcp.f32 %v277_v21 }
  0xd0   :  { %v467_v23 = vpop.eup %466  ;;  %v278_v24 = vadd.f32 1.0, %v465_v1 }
  0xd1   :  { %v469_v25 = vpop.eup %468  ;;  %v279_v26 = vadd.f32 1.0, %v467_v23 }
  0xd2   :  { %v471_v27 = vpop.eup %470  ;;  %348 = vst.msk [vmem:[%s771_s3 + $0x80] sm:$0xff] %vm331_vm1, %v469_v25  ;;  %482 = vrcp.f32 %v278_v24 }
  0xd3   :  { %v473_v28 = vpop.eup %472  ;;  %349 = vst.msk [vmem:[%s771_s3 + $0x88] sm:$0xff] %vm331_vm1, %v471_v27  ;;  %484 = vrcp.f32 %v279_v26 }
  0xd4   :  { %v280_v29 = vadd.f32 1.0, %v473_v28 }
  0xd5   :  { %v475_v30 = vpop.eup %474 }
  0xd6   :  { %350 = vst.msk [vmem:[%s771_s3 + $0x90] sm:$0xff] %vm331_vm1, %v475_v30  ;;  %486 = vrcp.f32 %v280_v29 }
  0xd7   :  { %v477_v31 = vpop.eup %476 }
  0xd8   :  { %v479_v32 = vpop.eup %478  ;;  %351 = vst.msk [vmem:[%s771_s3 + $0x98] sm:$0xff] %vm331_vm1, %v477_v31 }
  0xd9   :  { %v481_v33 = vpop.eup %480  ;;  %352 = vst.msk [vmem:[%s771_s3 + $0xa0] sm:$0xff] %vm331_vm1, %v479_v32 }
  0xda   :  { %353 = vst.msk [vmem:[%s771_s3 + $0xa8] sm:$0xff] %vm331_vm1, %v481_v33 }
  0xdc   :  { %v483_v34 = vpop.eup %482 }
  0xdd   :  { %v485_v35 = vpop.eup %484  ;;  %354 = vst.msk [vmem:[%s771_s3 + $0xb0] sm:$0xff] %vm331_vm1, %v483_v34 }
  0xde   :  { %355 = vst.msk [vmem:[%s771_s3 + $0xb8] sm:$0xff] %vm331_vm1, %v485_v35 }
  0xe0   :  { %v487_v36 = vpop.eup %486 }
  0xe1   :  { %356 = vst.msk [vmem:[%s771_s3 + $0xc0] sm:$0xff] %vm331_vm1, %v487_v36 }

</bundles_post_ra>
